<compile_context>
chip_gen: v6e
topology: v6e:2x2x1
jax: 0.10.0
libtpu: 0.0.40
codegen_flags: <defaults>
</compile_context>

<pallas_src>
import functools

import numpy as np
import jax
import jax.numpy as jnp
from jax import lax
from jax.experimental import pallas as pl
from jax.experimental.pallas import tpu as pltpu

EPS = 1e-5
LANE = 128
VMEM_LIMIT = 48 * 1024 * 1024   # headroom below v7x's 64 MiB physical VMEM


def _round_up(x, m):
    return (x + m - 1) // m * m


# ---------------------------------------------------------------------------
# Kernel A: conv-as-matmul + bias + ReLU, emit per-tile BN partials only.
# ---------------------------------------------------------------------------
def _conv_relu_stats_kernel(p_ref, w_ref, b_ref, mean_ref, m2_ref, *,
                            tm, tail_cnt):
    """Per-tile channel mean and M2 (sum of squared deviations) of ReLU(conv).

    `tail_cnt` is None when every row of every tile is valid; otherwise it is
    the number of valid rows in the LAST tile (only the last tile can contain
    zero-padded or undefined boundary rows).
    """
    acc = jnp.dot(p_ref[...], w_ref[...], preferred_element_type=jnp.float32)
    y = jnp.maximum(acc + b_ref[...], 0.0)
    c_pad = y.shape[1]

    def write(mu, m2):
        # Stats blocks are (1, 8, C_pad): broadcast the single row across the
        # 8 sublanes; the wrapper reads sublane 0.
        mean_ref[0] = jnp.broadcast_to(mu, (8, c_pad))
        m2_ref[0] = jnp.broadcast_to(m2, (8, c_pad))

    def full_stats():
        mu = jnp.sum(y, axis=0, keepdims=True) * (1.0 / tm)
        d = y - mu
        write(mu, jnp.sum(d * d, axis=0, keepdims=True))

    if tail_cnt is None:            # static: traced only when no tail exists
        full_stats()
    else:
        i = pl.program_id(0)
        last = pl.num_programs(0) - 1

        @pl.when(i != last)
        def _():
            full_stats()

        @pl.when(i == last)         # mask is paid on the last tile only
        def _():
            row = lax.broadcasted_iota(jnp.int32, (tm, 1), 0)
            valid = row < tail_cnt
            ym = jnp.where(valid, y, 0.0)
            mu = jnp.sum(ym, axis=0, keepdims=True) * (1.0 / tail_cnt)
            d = jnp.where(valid, y - mu, 0.0)
            write(mu, jnp.sum(d * d, axis=0, keepdims=True))


# ---------------------------------------------------------------------------
# Kernel B: recompute conv + bias + ReLU and apply folded BatchNorm scale/shift.
# ---------------------------------------------------------------------------
def _conv_relu_bn_kernel(p_ref, w_ref, b_ref, scale_ref, shift_ref, o_ref):
    acc = jnp.dot(p_ref[...], w_ref[...], preferred_element_type=jnp.float32)
    y = jnp.maximum(acc + b_ref[...], 0.0)
    o_ref[...] = y * scale_ref[...] + shift_ref[...]


# ---------------------------------------------------------------------------
# Glue: im2col (3x3, stride 2, pad 1) in plain JAX (bf16, fused by XLA).
# ---------------------------------------------------------------------------
def _im2col_3x3_s2(x_nhwc):
    """3x3 / stride-2 / pad-1 patches. Returns (N*Ho*Wo, 9*C), Ho, Wo."""
    N, H, W, C = x_nhwc.shape
    xp = jnp.pad(x_nhwc, ((0, 0), (1, 1), (1, 1), (0, 0)))
    Ho = (H - 1) // 2 + 1
    Wo = (W - 1) // 2 + 1
    cols = []
    for kh in range(3):
        for kw in range(3):
            cols.append(
                xp[:, kh:kh + 2 * (Ho - 1) + 1:2, kw:kw + 2 * (Wo - 1) + 1:2, :])
    patches = jnp.stack(cols, axis=3)                 # (N, Ho, Wo, 9, C)
    return patches.reshape(N * Ho * Wo, 9 * C), Ho, Wo


# ---------------------------------------------------------------------------
# Wrapper
# ---------------------------------------------------------------------------
def downsample_block(x_nchw, w, b, gamma, beta, *, tm=1024):
    """x_nchw: (N, C_in, H, W); w: (C_out, C_in, 3, 3) (PyTorch convention)."""
    N, C_in, H, W = x_nchw.shape
    C_out = w.shape[0]

    # NCHW -> NHWC and bf16 cast BEFORE the patch gather so XLA materializes a
    # single half-width patch matrix with no extra pad/cast pass.
    # TODO(synk): fuse this gather into the kernels (manual halo DMA, NHWC
    # boundary) so the im2col matrix and the transposes never touch HBM.
    x_nhwc = jnp.transpose(x_nchw, (0, 2, 3, 1)).astype(jnp.bfloat16)
    patches, Ho, Wo = _im2col_3x3_s2(x_nhwc)          # (M, K) bf16
    M, K = patches.shape

    C_pad = _round_up(C_out, LANE)       # lane-dense output channels
    K_store = _round_up(K, 8)            # sublane granule only; padding K to
                                         # 128 would inflate the dominant
                                         # patch read ~3.5x at small C_in.

    # Big row tiles; pad M only to a multiple of 16 (a partial last tile is
    # fine: invalid rows are masked out of the statistics and sliced off the
    # output in the wrapper).
    tm_eff = max(16, min(_round_up(tm, 16), _round_up(M, 16)))
    M_pad = _round_up(M, 16)
    n_tiles = (M_pad + tm_eff - 1) // tm_eff
    tail_cnt = M - (n_tiles - 1) * tm_eff             # valid rows, last tile

    patches_p = jnp.pad(patches, ((0, M_pad - M), (0, K_store - K)))
    # (C_out, C_in, kh, kw) -> (kh, kw, C_in, C_out) -> (K, C_out): matches the
    # (kh, kw, c) column ordering of _im2col_3x3_s2.
    w_mat = jnp.transpose(w, (2, 3, 1, 0)).reshape(K, C_out)
    w_mat = jnp.pad(w_mat, ((0, K_store - K), (0, C_pad - C_out))).astype(jnp.bfloat16)
    b_row = jnp.pad(b.astype(jnp.float32).reshape(1, C_out),
                    ((0, 0), (0, C_pad - C_out)))

    cp = pltpu.CompilerParams(
        dimension_semantics=("parallel",),    # megacore / dual-TC shardable
        vmem_limit_bytes=VMEM_LIMIT,
    )

    # --- kernel A: per-tile BN partials (pre-BN y never written to HBM) -----
    # TODO(synk): for very large C_in/C_out on v7x, tile K with an f32 VMEM
    # accumulator and single-buffer the (constant index_map) weight block.
    kernel_a = functools.partial(
        _conv_relu_stats_kernel, tm=tm_eff,
        tail_cnt=(None if tail_cnt == tm_eff else tail_cnt))
    mean_t, m2_t = pl.pallas_call(
        kernel_a,
        out_shape=(
            jax.ShapeDtypeStruct((n_tiles, 8, C_pad), jnp.float32),
            jax.ShapeDtypeStruct((n_tiles, 8, C_pad), jnp.float32),
        ),
        grid_spec=pltpu.PrefetchScalarGridSpec(
            num_scalar_prefetch=0,
            grid=(n_tiles,),
            in_specs=[
                pl.BlockSpec((tm_eff, K_store), lambda i: (i, 0)),
                pl.BlockSpec((K_store, C_pad), lambda i: (0, 0)),
                pl.BlockSpec((1, C_pad), lambda i: (0, 0)),
            ],
            out_specs=(
                pl.BlockSpec((1, 8, C_pad), lambda i: (i, 0, 0)),
                pl.BlockSpec((1, 8, C_pad), lambda i: (i, 0, 0)),
            ),
        ),
        compiler_params=cp,
    )(patches_p, w_mat, b_row)

    # --- finalize batch statistics: Chan combine of per-tile mean / M2 ------
    counts = jnp.asarray(
        np.minimum(tm_eff, M - np.arange(n_tiles) * tm_eff), dtype=jnp.float32)
    mu_t = mean_t[:, 0, :]                            # (n_tiles, C_pad)
    mean = jnp.sum(counts[:, None] * mu_t, axis=0) / M
    m2 = jnp.sum(m2_t[:, 0, :], axis=0) + \
        jnp.sum(counts[:, None] * (mu_t - mean[None, :]) ** 2, axis=0)
    var = m2 / M                                      # biased (PyTorch training BN)
    gamma_p = jnp.pad(gamma.astype(jnp.float32), (0, C_pad - C_out))
    beta_p = jnp.pad(beta.astype(jnp.float32), (0, C_pad - C_out))
    scale = gamma_p * lax.rsqrt(var + EPS)
    shift = beta_p - mean * scale

    # --- kernel B: recompute conv+ReLU, apply scale/shift, write output -----
    y_bn = pl.pallas_call(
        _conv_relu_bn_kernel,
        out_shape=jax.ShapeDtypeStruct((M_pad, C_pad), jnp.float32),
        grid_spec=pltpu.PrefetchScalarGridSpec(
            num_scalar_prefetch=0,
            grid=(n_tiles,),
            in_specs=[
                pl.BlockSpec((tm_eff, K_store), lambda i: (i, 0)),
                pl.BlockSpec((K_store, C_pad), lambda i: (0, 0)),
                pl.BlockSpec((1, C_pad), lambda i: (0, 0)),
                pl.BlockSpec((1, C_pad), lambda i: (0, 0)),
                pl.BlockSpec((1, C_pad), lambda i: (0, 0)),
            ],
            out_specs=pl.BlockSpec((tm_eff, C_pad), lambda i: (i, 0)),
        ),
        compiler_params=cp,
    )(patches_p, w_mat, b_row, scale.reshape(1, C_pad), shift.reshape(1, C_pad))

    out_nhwc = y_bn[:M, :C_out].reshape(N, Ho, Wo, C_out)
    return jnp.transpose(out_nhwc, (0, 3, 1, 2))      # back to NCHW


# ---------------------------------------------------------------------------
# Reference (plain JAX).  Conv operands are rounded to bf16 like the kernel's
# MXU operands so the comparison stays tight.
# ---------------------------------------------------------------------------
def _reference(x_nchw, w, b, gamma, beta):
    xr = x_nchw.astype(jnp.bfloat16).astype(jnp.float32)
    wr = w.astype(jnp.bfloat16).astype(jnp.float32)
    y = lax.conv_general_dilated(
        xr, wr, window_strides=(2, 2), padding=((1, 1), (1, 1)),
        dimension_numbers=("NCHW", "OIHW", "NCHW"),
    ) + b.astype(jnp.float32).reshape(1, -1, 1, 1)
    y = jnp.maximum(y, 0.0)
    mean = jnp.mean(y, axis=(0, 2, 3), keepdims=True)
    var = jnp.mean((y - mean) ** 2, axis=(0, 2, 3), keepdims=True)
    return (y - mean) * lax.rsqrt(var + EPS) * gamma.reshape(1, -1, 1, 1) \
        + beta.reshape(1, -1, 1, 1)


if __name__ == "__main__":
    def run_case(seed, N, C_in, H, W, C_out):
        key = jax.random.fold_in(jax.random.PRNGKey(0), seed)
        k_x, k_w, k_b, k_g, k_be = jax.random.split(key, 5)
        x = jax.random.normal(k_x, (N, C_in, H, W), dtype=jnp.float32)
        w = jax.random.normal(k_w, (C_out, C_in, 3, 3), dtype=jnp.float32) * 0.1
        b = jax.random.normal(k_b, (C_out,), dtype=jnp.float32) * 0.1
        gamma = 1.0 + 0.1 * jax.random.normal(k_g, (C_out,), dtype=jnp.float32)
        beta = 0.1 * jax.random.normal(k_be, (C_out,), dtype=jnp.float32)

        out = jax.block_until_ready(
            jax.jit(downsample_block)(x, w, b, gamma, beta))
        ref = _reference(x, w, b, gamma, beta)
        Ho, Wo = (H - 1) // 2 + 1, (W - 1) // 2 + 1
        assert out.shape == (N, C_out, Ho, Wo), (out.shape, (N, C_out, Ho, Wo))
        err = jnp.max(jnp.abs(out - ref))
        assert jnp.allclose(out, ref, atol=1e-3, rtol=1e-3), \
            f"mismatch vs reference, max abs err {err}"

    # Shapes implied by the module: small batch/channels; second case uses odd
    # spatial dims so the partial-tile statistics mask path is exercised.
    run_case(0, N=2, C_in=4, H=16, W=16, C_out=8)
    run_case(1, N=1, C_in=3, H=10, W=10, C_out=6)
    print("KERNEL_OK")
</pallas_src>

<mosaic_0001>
module attributes {stable_mosaic.version = 11 : i64} {
  func.func @_conv_relu_stats_kernel(%arg0: i32, %arg1: memref<128x40xbf16, #tpu.memory_space<vmem>>, %arg2: memref<40x128xbf16, #tpu.memory_space<vmem>>, %arg3: memref<1x128xf32, #tpu.memory_space<vmem>>, %arg4: memref<1x8x128xf32, #tpu.memory_space<vmem>>, %arg5: memref<1x8x128xf32, #tpu.memory_space<vmem>>) attributes {dimension_semantics = [#tpu.dimension_semantics<parallel>], iteration_bounds = array<i64: 1>, scalar_prefetch = 0 : i64, scratch_operands = 0 : i64, tpu.core_type = #tpu.core_type<tc>, window_params = [{transform_indices = @transform_0, window_bounds = array<i64: 128, 40>}, {pipeline_mode = #tpu.pipeline_mode<synchronous>, transform_indices = @transform_1, window_bounds = array<i64: 40, 128>}, {pipeline_mode = #tpu.pipeline_mode<synchronous>, transform_indices = @transform_2, window_bounds = array<i64: 1, 128>}, {transform_indices = @transform_3, window_bounds = array<i64: 1, 8, 128>}, {transform_indices = @transform_4, window_bounds = array<i64: 1, 8, 128>}]} {
    %c0 = arith.constant 0 : index
    %c0_0 = arith.constant 0 : index
    %0 = vector.load %arg1[%c0, %c0_0] : memref<128x40xbf16, #tpu.memory_space<vmem>>, vector<128x40xbf16>
    %c0_1 = arith.constant 0 : index
    %c0_2 = arith.constant 0 : index
    %1 = vector.load %arg2[%c0_1, %c0_2] : memref<40x128xbf16, #tpu.memory_space<vmem>>, vector<40x128xbf16>
    %cst = arith.constant dense<0.000000e+00> : vector<128x128xf32>
    %2 = tpu.matmul %0, %1, %cst {dimension_numbers = #tpu.dot_dimension_numbers<[1], [0], [0], [1], [0, 0, 1, 1], [], []>} : vector<128x40xbf16>, vector<40x128xbf16>, vector<128x128xf32> -> vector<128x128xf32>
    %c0_3 = arith.constant 0 : index
    %c0_4 = arith.constant 0 : index
    %3 = vector.load %arg3[%c0_3, %c0_4] : memref<1x128xf32, #tpu.memory_space<vmem>>, vector<1x128xf32>
    %4 = vector.broadcast %3 : vector<1x128xf32> to vector<128x128xf32>
    %5 = arith.addf %2, %4 : vector<128x128xf32>
    %cst_5 = arith.constant 0.000000e+00 : f32
    %6 = vector.broadcast %cst_5 : f32 to vector<128x128xf32>
    %7 = arith.maximumf %5, %6 : vector<128x128xf32>
    %cst_6 = arith.constant dense<0.000000e+00> : vector<128xf32>
    %8 = vector.multi_reduction <add>, %7, %cst_6 [0] : vector<128x128xf32> to vector<128xf32>
    %9 = vector.shape_cast %8 : vector<128xf32> to vector<1x128xf32>
    %cst_7 = arith.constant 7.812500e-03 : f32
    %10 = vector.broadcast %cst_7 : f32 to vector<1x128xf32>
    %11 = arith.mulf %9, %10 : vector<1x128xf32>
    %12 = vector.broadcast %11 : vector<1x128xf32> to vector<128x128xf32>
    %13 = arith.subf %7, %12 : vector<128x128xf32>
    %14 = arith.mulf %13, %13 : vector<128x128xf32>
    %cst_8 = arith.constant dense<0.000000e+00> : vector<128xf32>
    %15 = vector.multi_reduction <add>, %14, %cst_8 [0] : vector<128x128xf32> to vector<128xf32>
    %16 = vector.shape_cast %15 : vector<128xf32> to vector<1x128xf32>
    %17 = vector.shape_cast %11 : vector<1x128xf32> to vector<1x128xf32>
    %18 = vector.broadcast %17 : vector<1x128xf32> to vector<8x128xf32>
    %c0_9 = arith.constant 0 : index
    %c0_10 = arith.constant 0 : index
    %c0_11 = arith.constant 0 : index
    %19 = vector.load %arg4[%c0_9, %c0_10, %c0_11] : memref<1x8x128xf32, #tpu.memory_space<vmem>>, vector<1x8x128xf32>
    %20 = vector.shape_cast %19 : vector<1x8x128xf32> to vector<8x128xf32>
    %21 = vector.shape_cast %18 : vector<8x128xf32> to vector<1x8x128xf32>
    tpu.vector_store %arg4[%c0_9, %c0_10, %c0_11], %21 {strides = array<i32>} : memref<1x8x128xf32, #tpu.memory_space<vmem>>, vector<1x8x128xf32>,
    %22 = vector.shape_cast %16 : vector<1x128xf32> to vector<1x128xf32>
    %23 = vector.broadcast %22 : vector<1x128xf32> to vector<8x128xf32>
    %c0_12 = arith.constant 0 : index
    %c0_13 = arith.constant 0 : index
    %c0_14 = arith.constant 0 : index
    %24 = vector.load %arg5[%c0_12, %c0_13, %c0_14] : memref<1x8x128xf32, #tpu.memory_space<vmem>>, vector<1x8x128xf32>
    %25 = vector.shape_cast %24 : vector<1x8x128xf32> to vector<8x128xf32>
    %26 = vector.shape_cast %23 : vector<8x128xf32> to vector<1x8x128xf32>
    tpu.vector_store %arg5[%c0_12, %c0_13, %c0_14], %26 {strides = array<i32>} : memref<1x8x128xf32, #tpu.memory_space<vmem>>, vector<1x8x128xf32>,
    return
  }
  func.func @transform_0(%arg0: i32) -> (i32, i32) {
    %c0_i32 = arith.constant 0 : i32
    %c0_i32_0 = arith.constant 0 : i32
    return %arg0, %c0_i32 : i32, i32
  }
  func.func @transform_1(%arg0: i32) -> (i32, i32) {
    %c0_i32 = arith.constant 0 : i32
    %c0_i32_0 = arith.constant 0 : i32
    %c0_i32_1 = arith.constant 0 : i32
    return %c0_i32, %c0_i32_0 : i32, i32
  }
  func.func @transform_2(%arg0: i32) -> (i32, i32) {
    %c0_i32 = arith.constant 0 : i32
    %c0_i32_0 = arith.constant 0 : i32
    %c0_i32_1 = arith.constant 0 : i32
    return %c0_i32, %c0_i32_0 : i32, i32
  }
  func.func @transform_3(%arg0: i32) -> (i32, i32, i32) {
    %c0_i32 = arith.constant 0 : i32
    %c0_i32_0 = arith.constant 0 : i32
    %c0_i32_1 = arith.constant 0 : i32
    return %arg0, %c0_i32, %c0_i32_0 : i32, i32, i32
  }
  func.func @transform_4(%arg0: i32) -> (i32, i32, i32) {
    %c0_i32 = arith.constant 0 : i32
    %c0_i32_0 = arith.constant 0 : i32
    %c0_i32_1 = arith.constant 0 : i32
    return %arg0, %c0_i32, %c0_i32_0 : i32, i32, i32
  }
}

module attributes {stable_mosaic.version = 11 : i64} {
  func.func @_conv_relu_bn_kernel(%arg0: i32, %arg1: memref<128x40xbf16, #tpu.memory_space<vmem>>, %arg2: memref<40x128xbf16, #tpu.memory_space<vmem>>, %arg3: memref<1x128xf32, #tpu.memory_space<vmem>>, %arg4: memref<1x128xf32, #tpu.memory_space<vmem>>, %arg5: memref<1x128xf32, #tpu.memory_space<vmem>>, %arg6: memref<128x128xf32, #tpu.memory_space<vmem>>) attributes {dimension_semantics = [#tpu.dimension_semantics<parallel>], iteration_bounds = array<i64: 1>, scalar_prefetch = 0 : i64, scratch_operands = 0 : i64, tpu.core_type = #tpu.core_type<tc>, window_params = [{transform_indices = @transform_0, window_bounds = array<i64: 128, 40>}, {pipeline_mode = #tpu.pipeline_mode<synchronous>, transform_indices = @transform_1, window_bounds = array<i64: 40, 128>}, {pipeline_mode = #tpu.pipeline_mode<synchronous>, transform_indices = @transform_2, window_bounds = array<i64: 1, 128>}, {pipeline_mode = #tpu.pipeline_mode<synchronous>, transform_indices = @transform_3, window_bounds = array<i64: 1, 128>}, {pipeline_mode = #tpu.pipeline_mode<synchronous>, transform_indices = @transform_4, window_bounds = array<i64: 1, 128>}, {transform_indices = @transform_5, window_bounds = array<i64: 128, 128>}]} {
    %c0 = arith.constant 0 : index
    %c0_0 = arith.constant 0 : index
    %0 = vector.load %arg1[%c0, %c0_0] : memref<128x40xbf16, #tpu.memory_space<vmem>>, vector<128x40xbf16>
    %c0_1 = arith.constant 0 : index
    %c0_2 = arith.constant 0 : index
    %1 = vector.load %arg2[%c0_1, %c0_2] : memref<40x128xbf16, #tpu.memory_space<vmem>>, vector<40x128xbf16>
    %cst = arith.constant dense<0.000000e+00> : vector<128x128xf32>
    %2 = tpu.matmul %0, %1, %cst {dimension_numbers = #tpu.dot_dimension_numbers<[1], [0], [0], [1], [0, 0, 1, 1], [], []>} : vector<128x40xbf16>, vector<40x128xbf16>, vector<128x128xf32> -> vector<128x128xf32>
    %c0_3 = arith.constant 0 : index
    %c0_4 = arith.constant 0 : index
    %3 = vector.load %arg3[%c0_3, %c0_4] : memref<1x128xf32, #tpu.memory_space<vmem>>, vector<1x128xf32>
    %4 = vector.broadcast %3 : vector<1x128xf32> to vector<128x128xf32>
    %5 = arith.addf %2, %4 : vector<128x128xf32>
    %cst_5 = arith.constant 0.000000e+00 : f32
    %6 = vector.broadcast %cst_5 : f32 to vector<128x128xf32>
    %7 = arith.maximumf %5, %6 : vector<128x128xf32>
    %c0_6 = arith.constant 0 : index
    %c0_7 = arith.constant 0 : index
    %8 = vector.load %arg4[%c0_6, %c0_7] : memref<1x128xf32, #tpu.memory_space<vmem>>, vector<1x128xf32>
    %9 = vector.broadcast %8 : vector<1x128xf32> to vector<128x128xf32>
    %10 = arith.mulf %7, %9 : vector<128x128xf32>
    %c0_8 = arith.constant 0 : index
    %c0_9 = arith.constant 0 : index
    %11 = vector.load %arg5[%c0_8, %c0_9] : memref<1x128xf32, #tpu.memory_space<vmem>>, vector<1x128xf32>
    %12 = vector.broadcast %11 : vector<1x128xf32> to vector<128x128xf32>
    %13 = arith.addf %10, %12 : vector<128x128xf32>
    %c0_10 = arith.constant 0 : index
    %c0_11 = arith.constant 0 : index
    %14 = vector.load %arg6[%c0_10, %c0_11] : memref<128x128xf32, #tpu.memory_space<vmem>>, vector<128x128xf32>
    tpu.vector_store %arg6[%c0_10, %c0_11], %13 {strides = array<i32>} : memref<128x128xf32, #tpu.memory_space<vmem>>, vector<128x128xf32>,
    return
  }
  func.func @transform_0(%arg0: i32) -> (i32, i32) {
    %c0_i32 = arith.constant 0 : i32
    %c0_i32_0 = arith.constant 0 : i32
    return %arg0, %c0_i32 : i32, i32
  }
  func.func @transform_1(%arg0: i32) -> (i32, i32) {
    %c0_i32 = arith.constant 0 : i32
    %c0_i32_0 = arith.constant 0 : i32
    %c0_i32_1 = arith.constant 0 : i32
    return %c0_i32, %c0_i32_0 : i32, i32
  }
  func.func @transform_2(%arg0: i32) -> (i32, i32) {
    %c0_i32 = arith.constant 0 : i32
    %c0_i32_0 = arith.constant 0 : i32
    %c0_i32_1 = arith.constant 0 : i32
    return %c0_i32, %c0_i32_0 : i32, i32
  }
  func.func @transform_3(%arg0: i32) -> (i32, i32) {
    %c0_i32 = arith.constant 0 : i32
    %c0_i32_0 = arith.constant 0 : i32
    %c0_i32_1 = arith.constant 0 : i32
    return %c0_i32, %c0_i32_0 : i32, i32
  }
  func.func @transform_4(%arg0: i32) -> (i32, i32) {
    %c0_i32 = arith.constant 0 : i32
    %c0_i32_0 = arith.constant 0 : i32
    %c0_i32_1 = arith.constant 0 : i32
    return %c0_i32, %c0_i32_0 : i32, i32
  }
  func.func @transform_5(%arg0: i32) -> (i32, i32) {
    %c0_i32 = arith.constant 0 : i32
    %c0_i32_0 = arith.constant 0 : i32
    return %arg0, %c0_i32 : i32, i32
  }
}

</mosaic_0001>

<bundles_post_ra>
// kernel: downsample_block.3
= control target key start
LH: loop header
LB: loop body
LE: loop exit
PB: predicated region body
PF: predicated region fallthrough
CT: control target
= control target key end

     0   :  { %vm129_vm0 = vcmask 1043456   ;;  %vm104_vm1 = vcmask 326656   ;;  %s568_s1 = inlined_call_operand.vmem [shape: bf16[40,128], index: 1, kind: input, shape index: {}]   ;;  %s569_s0 = inlined_call_operand.vmem [shape: bf16[128,40], index: 0, kind: input, shape index: {}]   ;;  %s570_s2 = inlined_call_operand.vmem [shape: f32[1,128], index: 2, kind: input, shape index: {}]   ;;  %s571_s3 = inlined_call_operand.vmem [shape: f32[1,128], index: 3, kind: input, shape index: {}]   ;;  %s572_s4 = inlined_call_operand.vmem [shape: f32[1,128], index: 4, kind: input, shape index: {}]   ;;  %s573_s5 = inlined_call_operand.vmem [shape: f32[128,128], index: 5, kind: output, shape index: {}]  }
   0x1   :  { %v375_v0 = vld [vmem:[%s568_s1 + $0x10] ss:$0 sps:$4 sm:$0xff]   ;;  %v376_v1 = vld [vmem:[%s568_s1 + $0x8] sm:$0xff]   ;;  %v377_v3 = vld [vmem:[%s568_s1] sm:$0xff]  }
   0x2   :  { %373 = vmatprep.subr.msk.bf16.mxu0 %vm129_vm0, %v375_v0  ;;  %374 = vmatprep.subr.msk.bf16.mxu1 %vm129_vm0, %v375_v0  ;;  %v131_v2 = vsel %vm129_vm0, %v375_v0, 0  ;;  %v378_v4 = vld [vmem:[%s569_s0] sm:$0xff]   ;;  %v380_v6 = vld [vmem:[%s569_s0 + $0x8] sm:$0xff]   ;;  %v382_v8 = vld [vmem:[%s569_s0 + $0x10] sm:$0xff]  }
   0x3   :  { %346 = vmatpush3.bf16.msra.mxu0 %v131_v2  ;;  %370 = vmatpush3.bf16.msra.mxu1 %v131_v2  ;;  %v379_v5 = vld [vmem:[%s569_s0 + $0x20] sm:$0xff]   ;;  %v381_v7 = vld [vmem:[%s569_s0 + $0x28] sm:$0xff]   ;;  %v383_v9 = vld [vmem:[%s569_s0 + $0x30] sm:$0xff]  }
   0x4   :  { %347 = vmatprep.subr.bf16.mxu0 %v376_v1  ;;  %368 = vmatprep.subr.bf16.mxu1 %v376_v1  ;;  %v384_v10 = vld [vmem:[%s569_s0 + $0x18] sm:$0xff]   ;;  %v460_v12 = vld [vmem:[%s570_s2] ss:$0 sm:$0xff] }
   0x5   :  { %351 = vmatprep.mubr.msk.bf16.mxu0 %vm104_vm1, %v378_v4  ;;  %359 = vmatprep.mubr.msk.bf16.mxu1 %vm104_vm1, %v379_v5  ;;  %v385_v11 = vld [vmem:[%s569_s0 + $0x38] sm:$0xff]   ;;  %v467_v17 = vld [vmem:[%s571_s3] ss:$0 sm:$0xff] }
   0x6   :  { %v474_v24 = vld [vmem:[%s572_s4] ss:$0 sm:$0xff] }
   0x7   :  { %348 = vmatpush3.bf16.msra.mxu0 %v376_v1  ;;  %371 = vmatpush3.bf16.msra.mxu1 %v376_v1 }
   0x8   :  { %349 = vmatprep.subr.bf16.mxu0 %v377_v3  ;;  %369 = vmatprep.subr.bf16.mxu1 %v377_v3 }
   0xb   :  { %350 = vmatpush3.bf16.msra.mxu0 %v377_v3  ;;  %372 = vmatpush3.bf16.msra.mxu1 %v377_v3 }
   0xe   :  { %352 = vmatmul.mubr.msk.bf16.vlgmr.msra.gmra.mxu0 %vm104_vm1, %v380_v6  ;;  %360 = vmatmul.mubr.msk.bf16.vlgmr.msra.gmra.mxu1 %vm104_vm1, %v381_v7 }
   0xf   :  { %355 = vmatprep.mubr.msk.bf16.mxu0 %vm104_vm1, %v382_v8  ;;  %363 = vmatprep.mubr.msk.bf16.mxu1 %vm104_vm1, %v383_v9 }
  0x16   :  { %356 = vmatmul.mubr.msk.bf16.gmra.mxu0 %vm104_vm1, %v384_v10  ;;  %364 = vmatmul.mubr.msk.bf16.gmra.mxu1 %vm104_vm1, %v385_v11 }
  0xce   :  { %v353_v13 = vpop.f32.mrf.mxu0  ;;  %v361_v14 = vpop.f32.mrf.mxu1 }
  0xcf   :  { %v176_v15 = vadd.f32 %v353_v13, %v460_v12  ;;  %v208_v16 = vadd.f32 %v361_v14, %v460_v12 }
  0xd0   :  { %v167_v18 = vpop.f32.mrf.mxu0  ;;  %v199_v19 = vpop.f32.mrf.mxu1 }
  0xd1   :  { %v232_v20 = vmax.f32 %v176_v15, 0.0  ;;  %v240_v21 = vmax.f32 %v208_v16, 0.0  ;;  %v168_v22 = vadd.f32 %v460_v12, %v167_v18  ;;  %v200_v23 = vadd.f32 %v460_v12, %v199_v19 }
  0xd2   :  { %v354_v25 = vpop.f32.mrf.mxu0  ;;  %v362_v26 = vpop.f32.mrf.mxu1 }
  0xd3   :  { %v255_v27 = vmul.f32 %v467_v17, %v232_v20  ;;  %v263_v28 = vmul.f32 %v467_v17, %v240_v21  ;;  %v230_v29 = vmax.f32 %v168_v22, 0.0  ;;  %v238_v30 = vmax.f32 %v200_v23, 0.0 }
  0xd4   :  { %v179_v31 = vadd.f32 %v354_v25, %v460_v12  ;;  %v211_v32 = vadd.f32 %v362_v26, %v460_v12  ;;  %v170_v33 = vpop.f32.mrf.mxu0  ;;  %v202_v34 = vpop.f32.mrf.mxu1 }
  0xd5   :  { %v278_v35 = vadd.f32 %v474_v24, %v255_v27  ;;  %v286_v36 = vadd.f32 %v474_v24, %v263_v28  ;;  %v253_v37 = vmul.f32 %v467_v17, %v230_v29  ;;  %v261_v38 = vmul.f32 %v467_v17, %v238_v30 }
  0xd6   :  { %v233_v39 = vmax.f32 %v179_v31, 0.0  ;;  %v241_v40 = vmax.f32 %v211_v32, 0.0  ;;  %v171_v41 = vadd.f32 %v460_v12, %v170_v33  ;;  %v203_v42 = vadd.f32 %v460_v12, %v202_v34  ;;  %v357_v43 = vpop.f32.mrf.mxu0  ;;  %v365_v44 = vpop.f32.mrf.mxu1 }
  0xd7   :  { %294 = vst [vmem:[%s573_s5 + $0x10] sm:$0xff] %v278_v35  ;;  %302 = vst [vmem:[%s573_s5 + $0x50] sm:$0xff] %v286_v36  ;;  %v276_v45 = vadd.f32 %v474_v24, %v253_v37  ;;  %v284_v46 = vadd.f32 %v474_v24, %v261_v38  ;;  %v192_v47 = vadd.f32 %v357_v43, %v460_v12 }
  0xd8   :  { %v224_v48 = vadd.f32 %v365_v44, %v460_v12  ;;  %v256_v49 = vmul.f32 %v467_v17, %v233_v39  ;;  %v264_v50 = vmul.f32 %v467_v17, %v241_v40  ;;  %v231_v51 = vmax.f32 %v171_v41, 0.0  ;;  %v183_v53 = vpop.f32.mrf.mxu0  ;;  %v215_v54 = vpop.f32.mrf.mxu1 }
  0xd9   :  { %v239_v52 = vmax.f32 %v203_v42, 0.0  ;;  %292 = vst [vmem:[%s573_s5] sm:$0xff] %v276_v45  ;;  %300 = vst [vmem:[%s573_s5 + $0x40] sm:$0xff] %v284_v46  ;;  %v236_v55 = vmax.f32 %v192_v47, 0.0  ;;  %v184_v57 = vadd.f32 %v460_v12, %v183_v53  ;;  %v216_v58 = vadd.f32 %v460_v12, %v215_v54 }
  0xda   :  { %v244_v56 = vmax.f32 %v224_v48, 0.0  ;;  %v279_v59 = vadd.f32 %v474_v24, %v256_v49  ;;  %v287_v60 = vadd.f32 %v474_v24, %v264_v50  ;;  %v254_v61 = vmul.f32 %v467_v17, %v231_v51  ;;  %v358_v63 = vpop.f32.mrf.mxu0  ;;  %v366_v0 = vpop.f32.mrf.mxu1 }
  0xdb   :  { %v262_v62 = vmul.f32 %v467_v17, %v239_v52  ;;  %v259_v1 = vmul.f32 %v467_v17, %v236_v55  ;;  %v234_v3 = vmax.f32 %v184_v57, 0.0  ;;  %v242_v4 = vmax.f32 %v216_v58, 0.0 }
  0xdc   :  { %v267_v2 = vmul.f32 %v467_v17, %v244_v56  ;;  %295 = vst [vmem:[%s573_s5 + $0x18] sm:$0xff] %v279_v59  ;;  %303 = vst [vmem:[%s573_s5 + $0x58] sm:$0xff] %v287_v60  ;;  %v277_v5 = vadd.f32 %v474_v24, %v254_v61  ;;  %v195_v7 = vadd.f32 %v358_v63, %v460_v12  ;;  %v186_v9 = vpop.f32.mrf.mxu0  ;;  %v218_v10 = vpop.f32.mrf.mxu1 }
  0xdd   :  { %v285_v6 = vadd.f32 %v474_v24, %v262_v62  ;;  %v227_v8 = vadd.f32 %v366_v0, %v460_v12  ;;  %v282_v11 = vadd.f32 %v474_v24, %v259_v1  ;;  %v257_v14 = vmul.f32 %v467_v17, %v234_v3 }
  0xde   :  { %v290_v13 = vadd.f32 %v474_v24, %v267_v2  ;;  %v265_v15 = vmul.f32 %v467_v17, %v242_v4  ;;  %293 = vst [vmem:[%s573_s5 + $0x8] sm:$0xff] %v277_v5  ;;  %v237_v16 = vmax.f32 %v195_v7, 0.0  ;;  %v187_v19 = vadd.f32 %v460_v12, %v186_v9 }
  0xdf   :  { %301 = vst [vmem:[%s573_s5 + $0x48] sm:$0xff] %v285_v6  ;;  %v245_v18 = vmax.f32 %v227_v8, 0.0  ;;  %v219_v20 = vadd.f32 %v460_v12, %v218_v10  ;;  %298 = vst [vmem:[%s573_s5 + $0x30] sm:$0xff] %v282_v11  ;;  %v280_v21 = vadd.f32 %v474_v24, %v257_v14 }
  0xe0   :  { %306 = vst [vmem:[%s573_s5 + $0x70] sm:$0xff] %v290_v13  ;;  %v288_v22 = vadd.f32 %v474_v24, %v265_v15  ;;  %v260_v23 = vmul.f32 %v467_v17, %v237_v16  ;;  %v235_v26 = vmax.f32 %v187_v19, 0.0 }
  0xe1   :  { %v268_v25 = vmul.f32 %v467_v17, %v245_v18  ;;  %v243_v27 = vmax.f32 %v219_v20, 0.0  ;;  %296 = vst [vmem:[%s573_s5 + $0x20] sm:$0xff] %v280_v21 }
  0xe2   :  { %304 = vst [vmem:[%s573_s5 + $0x60] sm:$0xff] %v288_v22  ;;  %v283_v12 = vadd.f32 %v474_v24, %v260_v23  ;;  %v258_v29 = vmul.f32 %v467_v17, %v235_v26 }
  0xe3   :  { %v291_v28 = vadd.f32 %v474_v24, %v268_v25  ;;  %v266_v30 = vmul.f32 %v467_v17, %v243_v27 }
  0xe4   :  { %299 = vst [vmem:[%s573_s5 + $0x38] sm:$0xff] %v283_v12  ;;  %v281_v31 = vadd.f32 %v474_v24, %v258_v29 }
  0xe5   :  { %307 = vst [vmem:[%s573_s5 + $0x78] sm:$0xff] %v291_v28  ;;  %v289_v32 = vadd.f32 %v474_v24, %v266_v30 }
  0xe6   :  { %297 = vst [vmem:[%s573_s5 + $0x28] sm:$0xff] %v281_v31 }
  0xe7   :  { %305 = vst [vmem:[%s573_s5 + $0x68] sm:$0xff] %v289_v32 }

// kernel: downsample_block.2
= control target key start
LH: loop header
LB: loop body
LE: loop exit
PB: predicated region body
PF: predicated region fallthrough
CT: control target
= control target key end

     0   :  { %vm125_vm0 = vcmask 1043456   ;;  %vm100_vm1 = vcmask 326656   ;;  %s486_s1 = inlined_call_operand.vmem [shape: bf16[40,128], index: 1, kind: input, shape index: {}]   ;;  %s487_s0 = inlined_call_operand.vmem [shape: bf16[128,40], index: 0, kind: input, shape index: {}]   ;;  %s488_s2 = inlined_call_operand.vmem [shape: f32[1,128], index: 2, kind: input, shape index: {}]   ;;  %s489_s3 = inlined_call_operand.vmem [shape: f32[1,8,128], index: 3, kind: output, shape index: {0}]   ;;  %s490_s4 = inlined_call_operand.vmem [shape: f32[1,8,128], index: 4, kind: output, shape index: {1}]  }
   0x1   :  { %v388_v0 = vld [vmem:[%s486_s1 + $0x10] ss:$0 sps:$4 sm:$0xff]   ;;  %v389_v1 = vld [vmem:[%s486_s1 + $0x8] sm:$0xff]   ;;  %v391_v3 = vld [vmem:[%s487_s0] sm:$0xff]  }
   0x2   :  { %386 = vmatprep.subr.msk.bf16.mxu0 %vm125_vm0, %v388_v0  ;;  %v127_v2 = vsel %vm125_vm0, %v388_v0, 0  ;;  %387 = vmatprep.subr.msk.bf16.mxu1 %vm125_vm0, %v388_v0  ;;  %v390_v4 = vld [vmem:[%s486_s1] sm:$0xff]   ;;  %v392_v6 = vld [vmem:[%s487_s0 + $0x8] sm:$0xff]   ;;  %v393_v8 = vld [vmem:[%s487_s0 + $0x10] sm:$0xff]  }
   0x3   :  { %359 = vmatpush3.bf16.msra.mxu0 %v127_v2  ;;  %383 = vmatpush3.bf16.msra.mxu1 %v127_v2  ;;  %v395_v5 = vld [vmem:[%s487_s0 + $0x20] sm:$0xff]   ;;  %v396_v7 = vld [vmem:[%s487_s0 + $0x28] sm:$0xff]   ;;  %v397_v9 = vld [vmem:[%s487_s0 + $0x30] sm:$0xff]  }
   0x4   :  { %360 = vmatprep.subr.bf16.mxu0 %v389_v1  ;;  %381 = vmatprep.subr.bf16.mxu1 %v389_v1  ;;  %v394_v10 = vld [vmem:[%s487_s0 + $0x18] sm:$0xff]   ;;  %v327_v16 = vld [vmem:[%s488_s2] ss:$0 sm:$0xff] }
   0x5   :  { %364 = vmatprep.mubr.msk.bf16.mxu0 %vm100_vm1, %v391_v3  ;;  %372 = vmatprep.mubr.msk.bf16.mxu1 %vm100_vm1, %v395_v5  ;;  %v398_v11 = vld [vmem:[%s487_s0 + $0x38] sm:$0xff]  }
   0x7   :  { %361 = vmatpush3.bf16.msra.mxu0 %v389_v1  ;;  %384 = vmatpush3.bf16.msra.mxu1 %v389_v1 }
   0x8   :  { %362 = vmatprep.subr.bf16.mxu0 %v390_v4  ;;  %382 = vmatprep.subr.bf16.mxu1 %v390_v4 }
   0xb   :  { %363 = vmatpush3.bf16.msra.mxu0 %v390_v4  ;;  %385 = vmatpush3.bf16.msra.mxu1 %v390_v4 }
   0xe   :  { %365 = vmatmul.mubr.msk.bf16.vlgmr.msra.gmra.mxu0 %vm100_vm1, %v392_v6  ;;  %373 = vmatmul.mubr.msk.bf16.vlgmr.msra.gmra.mxu1 %vm100_vm1, %v396_v7 }
   0xf   :  { %368 = vmatprep.mubr.msk.bf16.mxu0 %vm100_vm1, %v393_v8  ;;  %376 = vmatprep.mubr.msk.bf16.mxu1 %vm100_vm1, %v397_v9 }
  0x16   :  { %369 = vmatmul.mubr.msk.bf16.gmra.mxu0 %vm100_vm1, %v394_v10  ;;  %377 = vmatmul.mubr.msk.bf16.gmra.mxu1 %vm100_vm1, %v398_v11 }
  0xce   :  { %v366_v12 = vpop.f32.mrf.mxu0  ;;  %v374_v13 = vpop.f32.mrf.mxu1 }
  0xcf   :  { %v470_v21 = vadd.f32 %v366_v12, %v327_v16  ;;  %v204_v52 = vadd.f32 %v374_v13, %v327_v16 }
  0xd0   :  { %v163_v14 = vpop.f32.mrf.mxu0  ;;  %v195_v15 = vpop.f32.mrf.mxu1 }
  0xd1   :  { %v468_v18 = vadd.f32 %v327_v16, %v163_v14  ;;  %v228_v29 = vmax.f32 %v470_v21, 0.0  ;;  %v196_v46 = vadd.f32 %v327_v16, %v195_v15  ;;  %v236_v59 = vmax.f32 %v204_v52, 0.0 }
  0xd2   :  { %v367_v17 = vpop.f32.mrf.mxu0  ;;  %v375_v20 = vpop.f32.mrf.mxu1 }
  0xd3   :  { %v226_v24 = vmax.f32 %v468_v18, 0.0  ;;  %v475_v25 = vadd.f32 %v367_v17, %v327_v16  ;;  %v234_v53 = vmax.f32 %v196_v46, 0.0  ;;  %v207_v55 = vadd.f32 %v375_v20, %v327_v16 }
  0xd4   :  { %v166_v19 = vpop.f32.mrf.mxu0  ;;  %v198_v28 = vpop.f32.mrf.mxu1 }
  0xd5   :  { %v472_v22 = vadd.f32 %v327_v16, %v166_v19  ;;  %v229_v33 = vmax.f32 %v475_v25, 0.0  ;;  %v199_v50 = vadd.f32 %v327_v16, %v198_v28  ;;  %v237_v62 = vmax.f32 %v207_v55, 0.0 }
  0xd6   :  { %v370_v23 = vpop.f32.mrf.mxu0  ;;  %v378_v36 = vpop.f32.mrf.mxu1 }
  0xd7   :  { %v227_v26 = vmax.f32 %v472_v22, 0.0  ;;  %v188_v37 = vadd.f32 %v370_v23, %v327_v16  ;;  %v235_v56 = vmax.f32 %v199_v50, 0.0  ;;  %v220_v1 = vadd.f32 %v378_v36, %v327_v16 }
  0xd8   :  { %v179_v27 = vpop.f32.mrf.mxu0  ;;  %v211_v44 = vpop.f32.mrf.mxu1 }
  0xd9   :  { %v242_v30 = vadd.f32 %v227_v26, %v226_v24  ;;  %v180_v31 = vadd.f32 %v327_v16, %v179_v27  ;;  %v232_v45 = vmax.f32 %v188_v37, 0.0  ;;  %v212_v61 = vadd.f32 %v327_v16, %v211_v44 }
  0xda   :  { %v371_v32 = vpop.f32.mrf.mxu0  ;;  %v379_v51 = vpop.f32.mrf.mxu1  ;;  %v240_v7 = vmax.f32 %v220_v1, 0.0 }
  0xdb   :  { %v243_v34 = vadd.f32 %v242_v30, %v228_v29  ;;  %v230_v38 = vmax.f32 %v180_v31, 0.0  ;;  %v191_v42 = vadd.f32 %v371_v32, %v327_v16  ;;  %v238_v2 = vmax.f32 %v212_v61, 0.0 }
  0xdc   :  { %v182_v35 = vpop.f32.mrf.mxu0  ;;  %v214_v58 = vpop.f32.mrf.mxu1  ;;  %v223_v5 = vadd.f32 %v379_v51, %v327_v16 }
  0xdd   :  { %v244_v39 = vadd.f32 %v243_v34, %v229_v33  ;;  %v183_v40 = vadd.f32 %v327_v16, %v182_v35  ;;  %v233_v48 = vmax.f32 %v191_v42, 0.0  ;;  %v215_v0 = vadd.f32 %v327_v16, %v214_v58 }
  0xde   :  { %v241_v9 = vmax.f32 %v223_v5, 0.0 }
  0xdf   :  { %v245_v41 = vadd.f32 %v244_v39, %v230_v38  ;;  %v231_v43 = vmax.f32 %v183_v40, 0.0  ;;  %v239_v6 = vmax.f32 %v215_v0, 0.0 }
  0xe1   :  { %v246_v47 = vadd.f32 %v245_v41, %v231_v43 }
  0xe3   :  { %v247_v49 = vadd.f32 %v246_v47, %v232_v45 }
  0xe5   :  { %v248_v54 = vadd.f32 %v247_v49, %v233_v48 }
  0xe7   :  { %v249_v57 = vadd.f32 %v248_v54, %v234_v53 }
  0xe9   :  { %v250_v60 = vadd.f32 %v249_v57, %v235_v56 }
  0xeb   :  { %v251_v63 = vadd.f32 %v250_v60, %v236_v59 }
  0xed   :  { %v252_v3 = vadd.f32 %v251_v63, %v237_v62 }
  0xef   :  { %v253_v4 = vadd.f32 %v252_v3, %v238_v2 }
  0xf1   :  { %v254_v8 = vadd.f32 %v253_v4, %v239_v6 }
  0xf3   :  { %v255_v10 = vadd.f32 %v254_v8, %v240_v7 }
  0xf5   :  { %v256_v11 = vadd.f32 %v255_v10, %v241_v9 }
  0xf7   :  { %v257_v12 = vrot.slane %v256_v11, 4 }
  0xf9   :  { %v258_v13 = vadd.f32 %v257_v12, %v256_v11 }
  0xfb   :  { %v259_v14 = vrot.slane %v258_v13, 2 }
  0xfd   :  { %v260_v15 = vadd.f32 %v259_v14, %v258_v13 }
  0xff   :  { %v261_v17 = vrot.slane %v260_v15, 1 }
 0x101   :  { %v262_v18 = vadd.f32 %v261_v17, %v260_v15 }
 0x103   :  { %v263_v19 = vmul.f32 0.0078125, %v262_v18 }
 0x105   :  { %v264_v20 = vsub.f32 %v226_v24, %v263_v19  ;;  %v265_v21 = vsub.f32 %v227_v26, %v263_v19  ;;  %317 = vst [vmem:[%s489_s3] sm:$0xff] %v263_v19  ;;  %v266_v16 = vsub.f32 %v228_v29, %v263_v19  ;;  %v267_v25 = vsub.f32 %v229_v33, %v263_v19 }
 0x106   :  { %v268_v27 = vsub.f32 %v230_v38, %v263_v19  ;;  %v269_v31 = vsub.f32 %v231_v43, %v263_v19  ;;  %v270_v35 = vsub.f32 %v232_v45, %v263_v19  ;;  %v271_v39 = vsub.f32 %v233_v48, %v263_v19 }
 0x107   :  { %v280_v22 = vmul.f32 %v264_v20, %v264_v20  ;;  %v281_v23 = vmul.f32 %v265_v21, %v265_v21  ;;  %v282_v28 = vmul.f32 %v266_v16, %v266_v16  ;;  %v283_v32 = vmul.f32 %v267_v25, %v267_v25 }
 0x108   :  { %v284_v36 = vmul.f32 %v268_v27, %v268_v27  ;;  %v285_v24 = vmul.f32 %v269_v31, %v269_v31  ;;  %v272_v40 = vsub.f32 %v234_v53, %v263_v19  ;;  %v286_v41 = vmul.f32 %v270_v35, %v270_v35 }
 0x109   :  { %v296_v30 = vadd.f32 %v281_v23, %v280_v22  ;;  %v273_v44 = vsub.f32 %v235_v56, %v263_v19  ;;  %v287_v29 = vmul.f32 %v271_v39, %v271_v39  ;;  %v274_v47 = vsub.f32 %v236_v59, %v263_v19 }
 0x10a   :  { %v288_v33 = vmul.f32 %v272_v40, %v272_v40  ;;  %v275_v49 = vsub.f32 %v237_v62, %v263_v19  ;;  %v276_v51 = vsub.f32 %v238_v2, %v263_v19  ;;  %v277_v54 = vsub.f32 %v239_v6, %v263_v19 }
 0x10b   :  { %v297_v34 = vadd.f32 %v296_v30, %v282_v28  ;;  %v289_v50 = vmul.f32 %v273_v44, %v273_v44  ;;  %v290_v52 = vmul.f32 %v274_v47, %v274_v47  ;;  %v278_v57 = vsub.f32 %v240_v7, %v263_v19 }
 0x10c   :  { %v291_v55 = vmul.f32 %v275_v49, %v275_v49  ;;  %v292_v58 = vmul.f32 %v276_v51, %v276_v51  ;;  %v279_v60 = vsub.f32 %v241_v9, %v263_v19  ;;  %v293_v61 = vmul.f32 %v277_v54, %v277_v54 }
 0x10d   :  { %v298_v37 = vadd.f32 %v297_v34, %v283_v32  ;;  %v294_v63 = vmul.f32 %v278_v57, %v278_v57 }
 0x10e   :  { %v295_v59 = vmul.f32 %v279_v60, %v279_v60 }
 0x10f   :  { %v299_v26 = vadd.f32 %v298_v37, %v284_v36 }
 0x111   :  { %v300_v42 = vadd.f32 %v299_v26, %v285_v24 }
 0x113   :  { %v301_v46 = vadd.f32 %v300_v42, %v286_v41 }
 0x115   :  { %v302_v38 = vadd.f32 %v301_v46, %v287_v29 }
 0x117   :  { %v303_v43 = vadd.f32 %v302_v38, %v288_v33 }
 0x119   :  { %v304_v45 = vadd.f32 %v303_v43, %v289_v50 }
 0x11b   :  { %v305_v48 = vadd.f32 %v304_v45, %v290_v52 }
 0x11d   :  { %v306_v53 = vadd.f32 %v305_v48, %v291_v55 }
 0x11f   :  { %v307_v56 = vadd.f32 %v306_v53, %v292_v58 }
 0x121   :  { %v308_v0 = vadd.f32 %v307_v56, %v293_v61 }
 0x123   :  { %v309_v1 = vadd.f32 %v308_v0, %v294_v63 }
 0x125   :  { %v310_v3 = vadd.f32 %v309_v1, %v295_v59 }
 0x127   :  { %v311_v62 = vrot.slane %v310_v3, 4 }
 0x129   :  { %v312_v4 = vadd.f32 %v311_v62, %v310_v3 }
 0x12b   :  { %v313_v5 = vrot.slane %v312_v4, 2 }
 0x12d   :  { %v314_v2 = vadd.f32 %v313_v5, %v312_v4 }
 0x12f   :  { %v315_v8 = vrot.slane %v314_v2, 1 }
 0x131   :  { %v316_v10 = vadd.f32 %v315_v8, %v314_v2 }
 0x133   :  { %318 = vst [vmem:[%s490_s4] sm:$0xff] %v316_v10 }

</bundles_post_ra>
